<compile_context>
chip_gen: v6e
topology: v6e:2x2x1
jax: 0.10.0
libtpu: 0.0.40
codegen_flags: <defaults>
</compile_context>

<pallas_src>
import functools

import jax
import jax.numpy as jnp
import numpy as np
from jax import lax
from jax.experimental import pallas as pl
from jax.experimental.pallas import tpu as pltpu

ROW_TILE = 128  # batch rows processed per grid step (multiple of 8, MXU friendly)


def doe_ffn_kernel(x_ref, *refs, n_layers: int):
    """refs = (w1, b1, w2, b2, ..., o_ref). Computes relu(...relu(x @ W1.T + b1)...)."""
    o_ref = refs[-1]
    h = x_ref[...]  # (ROW_TILE, d_in), f32
    for l in range(n_layers):
        w_ref = refs[2 * l]      # (d_out, d_in)  -- PyTorch layout
        b_ref = refs[2 * l + 1]  # (1, d_out)
        # x @ W.T without materializing a transpose: contract x's axis 1 with W's axis 1.
        h = lax.dot_general(
            h, w_ref[...],
            dimension_numbers=(((1,), (1,)), ((), ())),
            preferred_element_type=jnp.float32,
        )
        h = jnp.maximum(h + b_ref[...], 0.0)  # bias broadcast (1, d_out) -> (rows, d_out)
    o_ref[...] = h.astype(o_ref.dtype)


def doe_decoder_ffn(obs, weights, biases):
    """obs: (B, state_dim) f32. weights[i]: (d_out_i, d_in_i). biases[i]: (1, d_out_i)."""
    assert obs.ndim == 2
    B, D_in = obs.shape
    n_layers = len(weights)
    D_out = weights[-1].shape[0]

    # Pad batch to a multiple of ROW_TILE so every grid step gets a full tile.
    padded_B = ((B + ROW_TILE - 1) // ROW_TILE) * ROW_TILE
    if padded_B != B:
        obs = jnp.pad(obs, ((0, padded_B - B), (0, 0)))
    n_tiles = padded_B // ROW_TILE

    def full_spec(shape):
        return pl.BlockSpec(shape, lambda i: (0,) * len(shape))

    in_specs = [pl.BlockSpec((ROW_TILE, D_in), lambda i: (i, 0))]
    args = [obs]
    for w, b in zip(weights, biases):
        in_specs.append(full_spec(w.shape))
        in_specs.append(full_spec(b.shape))
        args.append(w)
        args.append(b)

    # Rough cost hint: 2*B*d_in*d_out flops per layer; bytes = activations + params + out.
    flops = sum(2 * padded_B * w.shape[0] * w.shape[1] for w in weights)
    bytes_accessed = 4 * (
        padded_B * D_in
        + sum(int(np.prod(w.shape)) + int(np.prod(b.shape)) for w, b in zip(weights, biases))
        + padded_B * D_out
    )

    kernel = functools.partial(doe_ffn_kernel, n_layers=n_layers)

    out = pl.pallas_call(
        kernel,
        out_shape=jax.ShapeDtypeStruct((padded_B, D_out), jnp.float32),
        grid_spec=pltpu.PrefetchScalarGridSpec(
            num_scalar_prefetch=0,
            grid=(n_tiles,),
            in_specs=in_specs,
            out_specs=pl.BlockSpec((ROW_TILE, D_out), lambda i: (i, 0)),
        ),
        compiler_params=pltpu.CompilerParams(dimension_semantics=("parallel",)),
        cost_estimate=pl.CostEstimate(
            flops=flops, transcendentals=0, bytes_accessed=bytes_accessed
        ),
    )(*args)

    return out[:B] if padded_B != B else out


def reference_forward(obs, weights, biases):
    """Pure-JAX mirror of DoeDecoderFFN.forward (gate = relu)."""
    h = obs
    for w, b in zip(weights, biases):
        h = jax.nn.relu(h @ w.T + b[0])
    return h


def init_params(key, state_dim, hidden_units):
    dims = (state_dim,) + tuple(hidden_units)
    weights, biases = [], []
    keys = jax.random.split(key, len(hidden_units))
    for k, d_in, d_out in zip(keys, dims[:-1], dims[1:]):
        # Xavier-uniform-ish weights, zero biases (matches the module's init spirit).
        limit = float(np.sqrt(6.0 / (d_in + d_out)))
        w = jax.random.uniform(k, (d_out, d_in), jnp.float32, -limit, limit)
        b = jnp.zeros((1, d_out), jnp.float32)
        weights.append(w)
        biases.append(b)
    return weights, biases


if __name__ == "__main__":
    state_dim = 32
    hidden_units = (64, 64)
    batch = 256  # 2 grid steps of 128 rows -> both v7x TensorCores busy

    key = jax.random.PRNGKey(0)
    k_obs, k_par = jax.random.split(key)
    obs = jax.random.normal(k_obs, (batch, state_dim), jnp.float32)
    weights, biases = init_params(k_par, state_dim, hidden_units)

    out = doe_decoder_ffn(obs, weights, biases)
    out = jax.block_until_ready(out)

    ref = reference_forward(obs, weights, biases)
    np.testing.assert_allclose(np.asarray(out), np.asarray(ref), rtol=1e-5, atol=1e-5)

    print("KERNEL_OK")
</pallas_src>

<mosaic_0001>
module attributes {stable_mosaic.version = 11 : i64} {
  func.func @doe_ffn_kernel(%arg0: i32, %arg1: memref<128x32xf32, #tpu.memory_space<vmem>>, %arg2: memref<64x32xf32, #tpu.memory_space<vmem>>, %arg3: memref<1x64xf32, #tpu.memory_space<vmem>>, %arg4: memref<64x64xf32, #tpu.memory_space<vmem>>, %arg5: memref<1x64xf32, #tpu.memory_space<vmem>>, %arg6: memref<128x64xf32, #tpu.memory_space<vmem>>) attributes {dimension_semantics = [#tpu.dimension_semantics<parallel>], iteration_bounds = array<i64: 2>, scalar_prefetch = 0 : i64, scratch_operands = 0 : i64, tpu.core_type = #tpu.core_type<tc>, window_params = [{transform_indices = @transform_0, window_bounds = array<i64: 128, 32>}, {pipeline_mode = #tpu.pipeline_mode<synchronous>, transform_indices = @transform_1, window_bounds = array<i64: 64, 32>}, {pipeline_mode = #tpu.pipeline_mode<synchronous>, transform_indices = @transform_2, window_bounds = array<i64: 1, 64>}, {pipeline_mode = #tpu.pipeline_mode<synchronous>, transform_indices = @transform_3, window_bounds = array<i64: 64, 64>}, {pipeline_mode = #tpu.pipeline_mode<synchronous>, transform_indices = @transform_4, window_bounds = array<i64: 1, 64>}, {transform_indices = @transform_5, window_bounds = array<i64: 128, 64>}]} {
    %c0 = arith.constant 0 : index
    %c0_0 = arith.constant 0 : index
    %0 = vector.load %arg1[%c0, %c0_0] : memref<128x32xf32, #tpu.memory_space<vmem>>, vector<128x32xf32>
    %c0_1 = arith.constant 0 : index
    %c0_2 = arith.constant 0 : index
    %1 = vector.load %arg2[%c0_1, %c0_2] : memref<64x32xf32, #tpu.memory_space<vmem>>, vector<64x32xf32>
    %cst = arith.constant dense<0.000000e+00> : vector<128x64xf32>
    %2 = tpu.matmul %0, %1, %cst {dimension_numbers = #tpu.dot_dimension_numbers<[1], [1], [0], [0], [0, 0, 1, 0], [], []>} : vector<128x32xf32>, vector<64x32xf32>, vector<128x64xf32> -> vector<128x64xf32>
    %c0_3 = arith.constant 0 : index
    %c0_4 = arith.constant 0 : index
    %3 = vector.load %arg3[%c0_3, %c0_4] : memref<1x64xf32, #tpu.memory_space<vmem>>, vector<1x64xf32>
    %4 = vector.broadcast %3 : vector<1x64xf32> to vector<128x64xf32>
    %5 = arith.addf %2, %4 : vector<128x64xf32>
    %cst_5 = arith.constant 0.000000e+00 : f32
    %6 = vector.broadcast %cst_5 : f32 to vector<128x64xf32>
    %7 = arith.maximumf %5, %6 : vector<128x64xf32>
    %c0_6 = arith.constant 0 : index
    %c0_7 = arith.constant 0 : index
    %8 = vector.load %arg4[%c0_6, %c0_7] : memref<64x64xf32, #tpu.memory_space<vmem>>, vector<64x64xf32>
    %cst_8 = arith.constant dense<0.000000e+00> : vector<128x64xf32>
    %9 = tpu.matmul %7, %8, %cst_8 {dimension_numbers = #tpu.dot_dimension_numbers<[1], [1], [0], [0], [0, 0, 1, 0], [], []>} : vector<128x64xf32>, vector<64x64xf32>, vector<128x64xf32> -> vector<128x64xf32>
    %c0_9 = arith.constant 0 : index
    %c0_10 = arith.constant 0 : index
    %10 = vector.load %arg5[%c0_9, %c0_10] : memref<1x64xf32, #tpu.memory_space<vmem>>, vector<1x64xf32>
    %11 = vector.broadcast %10 : vector<1x64xf32> to vector<128x64xf32>
    %12 = arith.addf %9, %11 : vector<128x64xf32>
    %cst_11 = arith.constant 0.000000e+00 : f32
    %13 = vector.broadcast %cst_11 : f32 to vector<128x64xf32>
    %14 = arith.maximumf %12, %13 : vector<128x64xf32>
    %c0_12 = arith.constant 0 : index
    %c0_13 = arith.constant 0 : index
    %15 = vector.load %arg6[%c0_12, %c0_13] : memref<128x64xf32, #tpu.memory_space<vmem>>, vector<128x64xf32>
    tpu.vector_store %arg6[%c0_12, %c0_13], %14 {strides = array<i32>} : memref<128x64xf32, #tpu.memory_space<vmem>>, vector<128x64xf32>,
    return
  }
  func.func @transform_0(%arg0: i32) -> (i32, i32) {
    %c0_i32 = arith.constant 0 : i32
    %c0_i32_0 = arith.constant 0 : i32
    return %arg0, %c0_i32 : i32, i32
  }
  func.func @transform_1(%arg0: i32) -> (i32, i32) {
    %c0_i32 = arith.constant 0 : i32
    %c0_i32_0 = arith.constant 0 : i32
    %c0_i32_1 = arith.constant 0 : i32
    return %c0_i32, %c0_i32_0 : i32, i32
  }
  func.func @transform_2(%arg0: i32) -> (i32, i32) {
    %c0_i32 = arith.constant 0 : i32
    %c0_i32_0 = arith.constant 0 : i32
    %c0_i32_1 = arith.constant 0 : i32
    return %c0_i32, %c0_i32_0 : i32, i32
  }
  func.func @transform_3(%arg0: i32) -> (i32, i32) {
    %c0_i32 = arith.constant 0 : i32
    %c0_i32_0 = arith.constant 0 : i32
    %c0_i32_1 = arith.constant 0 : i32
    return %c0_i32, %c0_i32_0 : i32, i32
  }
  func.func @transform_4(%arg0: i32) -> (i32, i32) {
    %c0_i32 = arith.constant 0 : i32
    %c0_i32_0 = arith.constant 0 : i32
    %c0_i32_1 = arith.constant 0 : i32
    return %c0_i32, %c0_i32_0 : i32, i32
  }
  func.func @transform_5(%arg0: i32) -> (i32, i32) {
    %c0_i32 = arith.constant 0 : i32
    %c0_i32_0 = arith.constant 0 : i32
    return %arg0, %c0_i32 : i32, i32
  }
}

</mosaic_0001>

<bundles_post_ra>
// kernel: tpu_custom_call.1
= control target key start
LH: loop header
LB: loop body
LE: loop exit
PB: predicated region body
PF: predicated region fallthrough
CT: control target
= control target key end

     0   :  { %s1049_s18 = smov 0   ;;  %s1243_s0 = inlined_call_operand.vmem [shape: f32[256,32], index: 0, kind: input, shape index: {}]   ;;  %s1244_s1 = inlined_call_operand.vmem [shape: f32[64,32], index: 1, kind: input, shape index: {}]   ;;  %s1245_s2 = inlined_call_operand.vmem [shape: f32[1,64], index: 2, kind: input, shape index: {}]   ;;  %s1246_s3 = inlined_call_operand.vmem [shape: f32[64,64], index: 3, kind: input, shape index: {}]   ;;  %s1247_s4 = inlined_call_operand.vmem [shape: f32[1,64], index: 4, kind: input, shape index: {}]   ;;  %s1248_s5 = inlined_call_operand.vmem [shape: f32[256,64], index: 5, kind: output, shape index: {}]  }
   0x1 LB: > { %s814_s19 = sadd.s32 4294967295, %s1017_s18   ;;  %p818_p0 = scmp.ge.s32.totalorder %s1017_s18, 1  ;;  %s1017_s18 = sphi %s1049_s18, %s15_s18  }
   0x2   : > { %p188_p1 = scmp.lt.s32.totalorder %s1017_s18, 3 }
   0x4   : > { %p189_p2 = pnand %p818_p0, %p188_p1 }
   0x5   : > { %s819_s24 = sshll.u32 (!%p189_p2), %s814_s19, 4 }
   0x6   : > { %192 = sbr.rel (%p189_p2) target bundleno = 472 (0x1d8), region = 40  ;;  %p217_p3 = scmp.lt.s32.totalorder (!%p189_p2), %s819_s24, 31 }
   0xb   : > { %v251_v0 = vld [vmem:[%s1244_s1 + $0x38] sm:$0xff]  ;;  %vm259_vm0 = vcmask 261120   ;;  %v250_v1 = vld [vmem:[%s1244_s1 + $0x30] sm:$0xff]  ;;  %vm508_vm1 = vcmask 523264   ;;  %s1250_s24 = smov (!%p217_p3, %s819_s24), 31  ;;  %v249_v4 = vld [vmem:[%s1244_s1 + $0x28] sm:$0xff] }
   0xc   : > { %923 = vmatprep.subr.msk.mxu0 %vm259_vm0, %v251_v0  ;;  %v500_v2 = vld [vmem:[%s1246_s3 + $0x38] sm:$0xff]  ;;  %v499_v3 = vld [vmem:[%s1246_s3 + $0x30] sm:$0xff]  ;;  %s820_s6 = sshll.u32 %s1250_s24, 3  ;;  %v498_v5 = vld [vmem:[%s1246_s3 + $0x28] sm:$0xff] }
   0xd   : > { %924 = vmatpush3.xpose.msk.msra.mxu0 %vm259_vm0, %v251_v0  ;;  %963 = vmatprep.subr.msk.mxu1 %vm508_vm1, %v500_v2  ;;  %s1087_s9 = scalar_lea.vmem %s1243_s0, %s820_s6  ;;  %v248_v7 = vld [vmem:[%s1244_s1 + $0x20] sm:$0xff]  ;;  %v247_v9 = vld [vmem:[%s1244_s1 + $0x18] sm:$0xff]  ;;  %v246_v11 = vld [vmem:[%s1244_s1 + $0x10] sm:$0xff]  ;;  %s1206_s16 = scalar_lea.vmem %s1248_s5, %s820_s6 }
   0xe   : > { %925 = vmatprep.subr.msk.mxu0 %vm259_vm0, %v250_v1  ;;  %964 = vmatpush3.xpose.msk.msra.mxu1 %vm508_vm1, %v500_v2  ;;  %v228_v6 = vld [vmem:[%s1087_s9] sm:$0xff]  ;;  %v496_v10 = vld [vmem:[%s1246_s3 + $0x18] sm:$0xff]  ;;  %v495_v12 = vld [vmem:[%s1246_s3 + $0x10] sm:$0xff] }
   0xf   : > { %965 = vmatprep.subr.msk.mxu1 %vm508_vm1, %v499_v3  ;;  %939 = vmatprep.mubr.msk.f32.mxu0 %vm259_vm0, %v228_v6  ;;  %v497_v8 = vld [vmem:[%s1246_s3 + $0x20] sm:$0xff]  ;;  %v245_v13 = vld [vmem:[%s1244_s1 + $0x8] sm:$0xff]  ;;  %v230_v16 = vld [vmem:[%s1087_s9 + $0x10] sm:$0xff] }
  0x10   : > { %v244_v14 = vld [vmem:[%s1244_s1] sm:$0xff]  ;;  %v229_v15 = vld [vmem:[%s1087_s9 + $0x8] sm:$0xff]  ;;  %v231_v17 = vld [vmem:[%s1087_s9 + $0x18] sm:$0xff] }
  0x11   : > { %926 = vmatpush3.xpose.msk.msra.mxu0 %vm259_vm0, %v250_v1  ;;  %v232_v18 = vld [vmem:[%s1087_s9 + $0x20] sm:$0xff]  ;;  %v233_v19 = vld [vmem:[%s1087_s9 + $0x28] sm:$0xff]  ;;  %v234_v20 = vld [vmem:[%s1087_s9 + $0x30] sm:$0xff] }
  0x12   : > { %927 = vmatprep.subr.msk.mxu0 %vm259_vm0, %v249_v4  ;;  %966 = vmatpush3.xpose.msk.msra.mxu1 %vm508_vm1, %v499_v3  ;;  %v235_v21 = vld [vmem:[%s1087_s9 + $0x38] sm:$0xff]  ;;  %v236_v22 = vld [vmem:[%s1087_s9 + $0x40] sm:$0xff]  ;;  %v237_v23 = vld [vmem:[%s1087_s9 + $0x48] sm:$0xff] }
  0x13   : > { %967 = vmatprep.subr.msk.mxu1 %vm508_vm1, %v498_v5  ;;  %v238_v24 = vld [vmem:[%s1087_s9 + $0x50] sm:$0xff]  ;;  %v239_v25 = vld [vmem:[%s1087_s9 + $0x58] sm:$0xff]  ;;  %v240_v26 = vld [vmem:[%s1087_s9 + $0x60] sm:$0xff] }
  0x14   : > { %v241_v27 = vld [vmem:[%s1087_s9 + $0x68] sm:$0xff]  ;;  %v242_v28 = vld [vmem:[%s1087_s9 + $0x70] sm:$0xff]  ;;  %v243_v29 = vld [vmem:[%s1087_s9 + $0x78] sm:$0xff] }
  0x15   : > { %928 = vmatpush3.xpose.msk.msra.mxu0 %vm259_vm0, %v249_v4  ;;  %v494_v30 = vld [vmem:[%s1246_s3 + $0x8] sm:$0xff]  ;;  %v493_v31 = vld [vmem:[%s1246_s3] sm:$0xff] }
  0x16   : > { %929 = vmatprep.subr.msk.mxu0 %vm259_vm0, %v248_v7  ;;  %968 = vmatpush3.xpose.msk.msra.mxu1 %vm508_vm1, %v498_v5  ;;  %v823_v32 = vld [vmem:[%s1245_s2] ss:$0 sm:$0xff] }
  0x17   : > { %969 = vmatprep.subr.msk.mxu1 %vm508_vm1, %v497_v8 }
  0x19   : > { %930 = vmatpush3.xpose.msk.msra.mxu0 %vm259_vm0, %v248_v7 }
  0x1a   : > { %931 = vmatprep.subr.msk.mxu0 %vm259_vm0, %v247_v9  ;;  %970 = vmatpush3.xpose.msk.msra.mxu1 %vm508_vm1, %v497_v8 }
  0x1b   : > { %971 = vmatprep.subr.msk.mxu1 %vm508_vm1, %v496_v10 }
  0x1d   : > { %932 = vmatpush3.xpose.msk.msra.mxu0 %vm259_vm0, %v247_v9 }
  0x1e   : > { %933 = vmatprep.subr.msk.mxu0 %vm259_vm0, %v246_v11  ;;  %972 = vmatpush3.xpose.msk.msra.mxu1 %vm508_vm1, %v496_v10 }
  0x1f   : > { %973 = vmatprep.subr.msk.mxu1 %vm508_vm1, %v495_v12 }
  0x21   : > { %934 = vmatpush3.xpose.msk.msra.mxu0 %vm259_vm0, %v246_v11 }
  0x22   : > { %935 = vmatprep.subr.msk.mxu0 %vm259_vm0, %v245_v13  ;;  %974 = vmatpush3.xpose.msk.msra.mxu1 %vm508_vm1, %v495_v12 }
  0x23   : > { %975 = vmatprep.subr.msk.mxu1 %vm508_vm1, %v494_v30 }
  0x25   : > { %936 = vmatpush3.xpose.msk.msra.mxu0 %vm259_vm0, %v245_v13 }
  0x26   : > { %937 = vmatprep.subr.msk.mxu0 %vm259_vm0, %v244_v14  ;;  %976 = vmatpush3.xpose.msk.msra.mxu1 %vm508_vm1, %v494_v30 }
  0x27   : > { %977 = vmatprep.subr.msk.mxu1 %vm508_vm1, %v493_v31 }
  0x29   : > { %938 = vmatpush3.xpose.msk.msra.mxu0 %vm259_vm0, %v244_v14 }
  0x2a   : > { %978 = vmatpush3.xpose.msk.msra.mxu1 %vm508_vm1, %v493_v31 }
  0x2c   : > { %940 = vmatmul.mubr.msk.f32.vlgmr.msra.gmra.mxu0 %vm259_vm0, %v229_v15 }
  0x2d   : > { %942 = vmatprep.mubr.msk.f32.mxu0 %vm259_vm0, %v230_v16 }
  0x30   : > { %943 = vmatmul.mubr.msk.f32.gmra.mxu0 %vm259_vm0, %v231_v17  ;;  %v848_v17 = vld [vmem:[%s1247_s4] ss:$0 sm:$0xff] }
  0x31   : > { %945 = vmatprep.mubr.msk.f32.mxu0 %vm259_vm0, %v232_v18 }
  0x34   : > { %946 = vmatmul.mubr.msk.f32.gmra.mxu0 %vm259_vm0, %v233_v19 }
  0x35   : > { %948 = vmatprep.mubr.msk.f32.mxu0 %vm259_vm0, %v234_v20 }
  0x38   : > { %949 = vmatmul.mubr.msk.f32.gmra.mxu0 %vm259_vm0, %v235_v21 }
  0x39   : > { %951 = vmatprep.mubr.msk.f32.mxu0 %vm259_vm0, %v236_v22 }
  0x3c   : > { %952 = vmatmul.mubr.msk.f32.gmra.mxu0 %vm259_vm0, %v237_v23 }
  0x3d   : > { %954 = vmatprep.mubr.msk.f32.mxu0 %vm259_vm0, %v238_v24 }
  0x40   : > { %955 = vmatmul.mubr.msk.f32.gmra.mxu0 %vm259_vm0, %v239_v25 }
  0x41   : > { %957 = vmatprep.mubr.msk.f32.mxu0 %vm259_vm0, %v240_v26 }
  0x44   : > { %958 = vmatmul.mubr.msk.f32.gmra.mxu0 %vm259_vm0, %v241_v27 }
  0x45   : > { %960 = vmatprep.mubr.msk.f32.mxu0 %vm259_vm0, %v242_v28 }
  0x48   : > { %961 = vmatmul.mubr.msk.f32.gmra.mxu0 %vm259_vm0, %v243_v29 }
  0xec   : > { %v941_v33 = vpop.f32.mrf.mxu0 }
  0xed   : > { %v404_v34 = vadd.f32 %v941_v33, %v823_v32 }
  0xee   : > { %v398_v35 = vpop.f32.mrf.mxu0 }
  0xef   : > { %v399_v36 = vadd.f32 %v823_v32, %v398_v35  ;;  %v478_v39 = vmax.f32 %v404_v34, 0.0 }
  0xf0   : > { %v944_v37 = vpop.f32.mrf.mxu0 }
  0xf1   : > { %v477_v38 = vmax.f32 %v399_v36, 0.0  ;;  %v414_v40 = vadd.f32 %v944_v37, %v823_v32 }
  0xf2   : > { %v408_v41 = vpop.f32.mrf.mxu0 }
  0xf3   : > { %v409_v42 = vadd.f32 %v823_v32, %v408_v41  ;;  %979 = vmatprep.mubr.msk.f32.mxu1 %vm508_vm1, %v477_v38  ;;  %v480_v45 = vmax.f32 %v414_v40, 0.0 }
  0xf4   : > { %v947_v43 = vpop.f32.mrf.mxu0  ;;  %980 = vmatmul.mubr.msk.f32.vlgmr.msra.gmra.mxu1 %vm508_vm1, %v478_v39 }
  0xf5   : > { %v479_v44 = vmax.f32 %v409_v42, 0.0  ;;  %v424_v46 = vadd.f32 %v947_v43, %v823_v32 }
  0xf6   : > { %v418_v47 = vpop.f32.mrf.mxu0 }
  0xf7   : > { %v419_v48 = vadd.f32 %v823_v32, %v418_v47  ;;  %982 = vmatprep.mubr.msk.f32.mxu1 %vm508_vm1, %v479_v44  ;;  %v482_v51 = vmax.f32 %v424_v46, 0.0 }
  0xf8   : > { %v950_v49 = vpop.f32.mrf.mxu0  ;;  %983 = vmatmul.mubr.msk.f32.gmra.mxu1 %vm508_vm1, %v480_v45 }
  0xf9   : > { %v481_v50 = vmax.f32 %v419_v48, 0.0  ;;  %v434_v52 = vadd.f32 %v950_v49, %v823_v32 }
  0xfa   : > { %v428_v53 = vpop.f32.mrf.mxu0 }
  0xfb   : > { %v429_v54 = vadd.f32 %v823_v32, %v428_v53  ;;  %985 = vmatprep.mubr.msk.f32.mxu1 %vm508_vm1, %v481_v50  ;;  %v484_v57 = vmax.f32 %v434_v52, 0.0 }
  0xfc   : > { %v953_v55 = vpop.f32.mrf.mxu0  ;;  %986 = vmatmul.mubr.msk.f32.gmra.mxu1 %vm508_vm1, %v482_v51 }
  0xfd   : > { %v483_v56 = vmax.f32 %v429_v54, 0.0  ;;  %v444_v58 = vadd.f32 %v953_v55, %v823_v32 }
  0xfe   : > { %v438_v59 = vpop.f32.mrf.mxu0 }
  0xff   : > { %v439_v60 = vadd.f32 %v823_v32, %v438_v59  ;;  %988 = vmatprep.mubr.msk.f32.mxu1 %vm508_vm1, %v483_v56  ;;  %v486_v63 = vmax.f32 %v444_v58, 0.0 }
 0x100   : > { %v956_v61 = vpop.f32.mrf.mxu0  ;;  %989 = vmatmul.mubr.msk.f32.gmra.mxu1 %vm508_vm1, %v484_v57 }
 0x101   : > { %v485_v62 = vmax.f32 %v439_v60, 0.0  ;;  %v454_v0 = vadd.f32 %v956_v61, %v823_v32 }
 0x102   : > { %v448_v1 = vpop.f32.mrf.mxu0 }
 0x103   : > { %v449_v2 = vadd.f32 %v823_v32, %v448_v1  ;;  %991 = vmatprep.mubr.msk.f32.mxu1 %vm508_vm1, %v485_v62  ;;  %v488_v5 = vmax.f32 %v454_v0, 0.0 }
 0x104   : > { %v959_v3 = vpop.f32.mrf.mxu0  ;;  %992 = vmatmul.mubr.msk.f32.gmra.mxu1 %vm508_vm1, %v486_v63 }
 0x105   : > { %v487_v4 = vmax.f32 %v449_v2, 0.0  ;;  %v464_v6 = vadd.f32 %v959_v3, %v823_v32 }
 0x106   : > { %v458_v7 = vpop.f32.mrf.mxu0 }
 0x107   : > { %v459_v8 = vadd.f32 %v823_v32, %v458_v7  ;;  %994 = vmatprep.mubr.msk.f32.mxu1 %vm508_vm1, %v487_v4  ;;  %v490_v11 = vmax.f32 %v464_v6, 0.0 }
 0x108   : > { %v962_v9 = vpop.f32.mrf.mxu0  ;;  %995 = vmatmul.mubr.msk.f32.gmra.mxu1 %vm508_vm1, %v488_v5 }
 0x109   : > { %v489_v10 = vmax.f32 %v459_v8, 0.0  ;;  %v474_v12 = vadd.f32 %v962_v9, %v823_v32 }
 0x10a   : > { %v468_v13 = vpop.f32.mrf.mxu0 }
 0x10b   : > { %v469_v14 = vadd.f32 %v823_v32, %v468_v13  ;;  %997 = vmatprep.mubr.msk.f32.mxu1 %vm508_vm1, %v489_v10  ;;  %v492_v16 = vmax.f32 %v474_v12, 0.0 }
 0x10c   : > { %998 = vmatmul.mubr.msk.f32.gmra.mxu1 %vm508_vm1, %v490_v11 }
 0x10d   : > { %v491_v15 = vmax.f32 %v469_v14, 0.0 }
 0x10f   : > { %1000 = vmatprep.mubr.msk.f32.mxu1 %vm508_vm1, %v491_v15 }
 0x110   : > { %1001 = vmatmul.mubr.msk.f32.gmra.mxu1 %vm508_vm1, %v492_v16 }
 0x1b4   : > { %v981_v18 = vpop.f32.mrf.mxu1 }
 0x1b5   : > { %v653_v19 = vadd.f32 %v981_v18, %v848_v17 }
 0x1b6   : > { %v647_v20 = vpop.f32.mrf.mxu1 }
 0x1b7   : > { %v727_v21 = vmax.f32 %v653_v19, 0.0  ;;  %v648_v22 = vadd.f32 %v848_v17, %v647_v20 }
 0x1b8   : > { %v984_v23 = vpop.f32.mrf.mxu1 }
 0x1b9   : > { %743 = vst.msk [vmem:[%s1206_s16 + $0x8] sm:$0xff] %vm508_vm1, %v727_v21  ;;  %v726_v24 = vmax.f32 %v648_v22, 0.0  ;;  %v663_v25 = vadd.f32 %v984_v23, %v848_v17 }
 0x1ba   : > { %v657_v26 = vpop.f32.mrf.mxu1 }
 0x1bb   : > { %742 = vst.msk [vmem:[%s1206_s16] sm:$0xff] %vm508_vm1, %v726_v24  ;;  %v729_v27 = vmax.f32 %v663_v25, 0.0  ;;  %v658_v28 = vadd.f32 %v848_v17, %v657_v26 }
 0x1bc   : > { %v987_v29 = vpop.f32.mrf.mxu1 }
 0x1bd   : > { %745 = vst.msk [vmem:[%s1206_s16 + $0x18] sm:$0xff] %vm508_vm1, %v729_v27  ;;  %v728_v30 = vmax.f32 %v658_v28, 0.0  ;;  %v673_v31 = vadd.f32 %v987_v29, %v848_v17 }
 0x1be   : > { %v667_v32 = vpop.f32.mrf.mxu1 }
 0x1bf   : > { %744 = vst.msk [vmem:[%s1206_s16 + $0x10] sm:$0xff] %vm508_vm1, %v728_v30  ;;  %v731_v33 = vmax.f32 %v673_v31, 0.0  ;;  %v668_v34 = vadd.f32 %v848_v17, %v667_v32 }
 0x1c0   : > { %v990_v35 = vpop.f32.mrf.mxu1 }
 0x1c1   : > { %747 = vst.msk [vmem:[%s1206_s16 + $0x28] sm:$0xff] %vm508_vm1, %v731_v33  ;;  %v730_v36 = vmax.f32 %v668_v34, 0.0  ;;  %v683_v37 = vadd.f32 %v990_v35, %v848_v17 }
 0x1c2   : > { %v677_v38 = vpop.f32.mrf.mxu1 }
 0x1c3   : > { %746 = vst.msk [vmem:[%s1206_s16 + $0x20] sm:$0xff] %vm508_vm1, %v730_v36  ;;  %v733_v39 = vmax.f32 %v683_v37, 0.0  ;;  %v678_v40 = vadd.f32 %v848_v17, %v677_v38 }
 0x1c4   : > { %v993_v41 = vpop.f32.mrf.mxu1 }
 0x1c5   : > { %749 = vst.msk [vmem:[%s1206_s16 + $0x38] sm:$0xff] %vm508_vm1, %v733_v39  ;;  %v732_v42 = vmax.f32 %v678_v40, 0.0  ;;  %v693_v43 = vadd.f32 %v993_v41, %v848_v17 }
 0x1c6   : > { %v687_v44 = vpop.f32.mrf.mxu1 }
 0x1c7   : > { %748 = vst.msk [vmem:[%s1206_s16 + $0x30] sm:$0xff] %vm508_vm1, %v732_v42  ;;  %v735_v45 = vmax.f32 %v693_v43, 0.0  ;;  %v688_v46 = vadd.f32 %v848_v17, %v687_v44 }
 0x1c8   : > { %v996_v47 = vpop.f32.mrf.mxu1 }
 0x1c9   : > { %751 = vst.msk [vmem:[%s1206_s16 + $0x48] sm:$0xff] %vm508_vm1, %v735_v45  ;;  %v734_v48 = vmax.f32 %v688_v46, 0.0  ;;  %v703_v49 = vadd.f32 %v996_v47, %v848_v17 }
 0x1ca   : > { %v697_v50 = vpop.f32.mrf.mxu1 }
 0x1cb   : > { %750 = vst.msk [vmem:[%s1206_s16 + $0x40] sm:$0xff] %vm508_vm1, %v734_v48  ;;  %v737_v51 = vmax.f32 %v703_v49, 0.0  ;;  %v698_v52 = vadd.f32 %v848_v17, %v697_v50 }
 0x1cc   : > { %v999_v53 = vpop.f32.mrf.mxu1 }
 0x1cd   : > { %753 = vst.msk [vmem:[%s1206_s16 + $0x58] sm:$0xff] %vm508_vm1, %v737_v51  ;;  %v736_v54 = vmax.f32 %v698_v52, 0.0  ;;  %v713_v55 = vadd.f32 %v999_v53, %v848_v17 }
 0x1ce   : > { %v707_v56 = vpop.f32.mrf.mxu1 }
 0x1cf   : > { %752 = vst.msk [vmem:[%s1206_s16 + $0x50] sm:$0xff] %vm508_vm1, %v736_v54  ;;  %v739_v57 = vmax.f32 %v713_v55, 0.0  ;;  %v708_v58 = vadd.f32 %v848_v17, %v707_v56 }
 0x1d0   : > { %v1002_v59 = vpop.f32.mrf.mxu1 }
 0x1d1   : > { %755 = vst.msk [vmem:[%s1206_s16 + $0x68] sm:$0xff] %vm508_vm1, %v739_v57  ;;  %v738_v60 = vmax.f32 %v708_v58, 0.0  ;;  %v723_v61 = vadd.f32 %v1002_v59, %v848_v17 }
 0x1d2   : > { %v717_v62 = vpop.f32.mrf.mxu1 }
 0x1d3   : > { %754 = vst.msk [vmem:[%s1206_s16 + $0x60] sm:$0xff] %vm508_vm1, %v738_v60  ;;  %v741_v63 = vmax.f32 %v723_v61, 0.0  ;;  %v718_v0 = vadd.f32 %v848_v17, %v717_v62 }
 0x1d5   : > { %757 = vst.msk [vmem:[%s1206_s16 + $0x78] sm:$0xff] %vm508_vm1, %v741_v63  ;;  %v740_v1 = vmax.f32 %v718_v0, 0.0 }
 0x1d7   : > { %756 = vst.msk [vmem:[%s1206_s16 + $0x70] sm:$0xff] %vm508_vm1, %v740_v1 }
 0x1d8 PF: > { %s15_s18 = sadd.s32 1, %s1017_s18  }
 0x1d9   : > { %p12_p4 = scmp.ge.s32.totalorder %s15_s18, 4  }
 0x1db   :  { %14 = sbr.rel (!%p12_p4) target bundleno = 1 (0x1), region = 70 }

</bundles_post_ra>
